<compile_context>
chip_gen: v7x
topology: tpu7x:2x2x1
jax: 0.10.0
libtpu: 0.0.40
codegen_flags: <defaults>
</compile_context>

<pallas_src>
import jax
import jax.numpy as jnp
from jax.experimental import pallas as pl
from jax.experimental.pallas import tpu as pltpu

_LANE_CHOICES = (512, 256, 128)          # lane-dense last-dim candidates
_TARGET_BLOCK_BYTES = 2 * 1024 * 1024    # per-operand per-block VMEM budget
_SINGLE_BLOCK_BYTES = 1 * 1024 * 1024    # below this: one full-extent block
_MIN_GRID_STEPS = 8                      # steps needed for pipeline steady state


def _mul_kernel(x_ref, y_ref, o_ref):
    # Elementwise multiply on the current VMEM-resident tile.
    o_ref[...] = x_ref[...] * y_ref[...]


def _mul_2d(x2, y2, rows, lanes, itemsize):
    """Run the Pallas multiply on a lane-dense (rows, lanes) view."""
    per_operand_bytes = rows * lanes * itemsize

    if per_operand_bytes <= _SINGLE_BLOCK_BYTES:
        # One full-extent block: bypasses the (8,128) divisibility rule and
        # pipelining would not help at this size anyway.
        block_rows = rows
    else:
        # Tile over rows. Aim for >= _MIN_GRID_STEPS grid steps so the
        # double-buffered DMA pipeline overlaps HBM traffic, but cap the block
        # at ~2 MiB per operand so the live VMEM footprint (~12 MiB) fits every
        # generation's default scoped-VMEM limit (v7x has only 64 MiB physical).
        max_block_rows = max(8, (_TARGET_BLOCK_BYTES // (lanes * itemsize)) // 8 * 8)
        steps_block_rows = max(8, (rows // _MIN_GRID_STEPS) // 8 * 8)
        block_rows = min(max_block_rows, steps_block_rows)

    # Ragged final row block (rows % block_rows != 0) is masked by Pallas;
    # no padding of the operands is ever required.
    grid = (pl.cdiv(rows, block_rows),)

    return pl.pallas_call(
        _mul_kernel,
        out_shape=jax.ShapeDtypeStruct((rows, lanes), x2.dtype),
        grid=grid,
        in_specs=[
            pl.BlockSpec((block_rows, lanes), lambda i: (i, 0)),
            pl.BlockSpec((block_rows, lanes), lambda i: (i, 0)),
        ],
        out_specs=pl.BlockSpec((block_rows, lanes), lambda i: (i, 0)),
        # TODO(synk): on v7x, confirm with a profile that the "parallel" axis
        # actually shards across both TensorCores; if not, switch this axis to
        # pltpu.CORE_PARALLEL.
        compiler_params=pltpu.CompilerParams(
            dimension_semantics=("parallel",),
        ),
        cost_estimate=pl.CostEstimate(
            flops=rows * lanes,
            transcendentals=0,
            bytes_accessed=3 * rows * lanes * itemsize,
        ),
    )(x2, y2)


def pallas_mul(x, y):
    """Elementwise x * y via a Pallas TPU kernel.

    x and y must have the same shape and dtype (matches the test module's
    usage; PyTorch broadcasting / mixed dtypes are not exercised here).
    """
    assert x.shape == y.shape, "Mul kernel expects identical shapes"
    assert x.dtype == y.dtype, "Mul kernel expects identical dtypes"

    orig_shape = x.shape
    total = int(x.size)
    itemsize = jnp.dtype(x.dtype).itemsize

    if total == 0:
        return x * y

    # Flatten to 1D (free for contiguous arrays).
    xf = x.reshape(-1)
    yf = y.reshape(-1)

    # 128-aligned prefix goes through the kernel; any <128-element tail is a
    # trivial JAX epilogue — no O(N) pad copy of the operands.
    main = (total // 128) * 128
    if main == 0:
        # Fewer than 128 elements: a plain fused multiply is already optimal.
        return x * y

    # Widest lane-dense last dim that divides the prefix (full unmasked vst).
    lanes = next(l for l in _LANE_CHOICES if main % l == 0)
    rows = main // lanes

    if main == total:
        xm, ym = xf, yf
    else:
        xm, ym = xf[:main], yf[:main]

    out_main = _mul_2d(
        xm.reshape(rows, lanes), ym.reshape(rows, lanes), rows, lanes, itemsize
    ).reshape(-1)

    if main == total:
        out = out_main
    else:
        tail = xf[main:] * yf[main:]          # < 128 elements
        out = jnp.concatenate([out_main, tail])

    return out.reshape(orig_shape)


if __name__ == "__main__":
    key = jax.random.PRNGKey(0)
    kx, ky = jax.random.split(key)

    # Small NCHW-style inputs, same shape for both operands.
    shape = (2, 4, 16, 16)
    x = jax.random.normal(kx, shape, dtype=jnp.float32)
    y = jax.random.normal(ky, shape, dtype=jnp.float32)

    out = pallas_mul(x, y)
    out = jax.block_until_ready(out)

    # Correctness check against the reference elementwise product.
    ref = x * y
    assert out.shape == ref.shape
    assert jnp.allclose(out, ref, atol=1e-6, rtol=1e-6)

    print("KERNEL_OK")
</pallas_src>

<mosaic_0001>
module attributes {stable_mosaic.version = 11 : i64} {
  func.func @_mul_kernel(%arg0: i32, %arg1: memref<4x512xf32, #tpu.memory_space<vmem>>, %arg2: memref<4x512xf32, #tpu.memory_space<vmem>>, %arg3: memref<4x512xf32, #tpu.memory_space<vmem>>) attributes {dimension_semantics = [#tpu.dimension_semantics<parallel>], iteration_bounds = array<i64: 1>, scalar_prefetch = 0 : i64, scratch_operands = 0 : i64, tpu.core_type = #tpu.core_type<tc>, window_params = [{transform_indices = @transform_0, window_bounds = array<i64: 4, 512>}, {transform_indices = @transform_1, window_bounds = array<i64: 4, 512>}, {transform_indices = @transform_2, window_bounds = array<i64: 4, 512>}]} {
    %c0 = arith.constant 0 : index
    %c0_0 = arith.constant 0 : index
    %0 = vector.load %arg1[%c0, %c0_0] : memref<4x512xf32, #tpu.memory_space<vmem>>, vector<4x512xf32>
    %c0_1 = arith.constant 0 : index
    %c0_2 = arith.constant 0 : index
    %1 = vector.load %arg2[%c0_1, %c0_2] : memref<4x512xf32, #tpu.memory_space<vmem>>, vector<4x512xf32>
    %2 = arith.mulf %0, %1 : vector<4x512xf32>
    %c0_3 = arith.constant 0 : index
    %c0_4 = arith.constant 0 : index
    %3 = vector.load %arg3[%c0_3, %c0_4] : memref<4x512xf32, #tpu.memory_space<vmem>>, vector<4x512xf32>
    tpu.vector_store %arg3[%c0_3, %c0_4], %2 {strides = array<i32>} : memref<4x512xf32, #tpu.memory_space<vmem>>, vector<4x512xf32>,
    return
  }
  func.func @transform_0(%arg0: i32) -> (i32, i32) {
    %c0_i32 = arith.constant 0 : i32
    %c0_i32_0 = arith.constant 0 : i32
    return %arg0, %c0_i32 : i32, i32
  }
  func.func @transform_1(%arg0: i32) -> (i32, i32) {
    %c0_i32 = arith.constant 0 : i32
    %c0_i32_0 = arith.constant 0 : i32
    return %arg0, %c0_i32 : i32, i32
  }
  func.func @transform_2(%arg0: i32) -> (i32, i32) {
    %c0_i32 = arith.constant 0 : i32
    %c0_i32_0 = arith.constant 0 : i32
    return %arg0, %c0_i32 : i32, i32
  }
}

</mosaic_0001>

<bundles_post_ra>
// kernel: tpu_custom_call.1
= control target key start
LH: loop header
LB: loop body
LE: loop exit
PB: predicated region body
PF: predicated region fallthrough
CT: control target
= control target key end

     0   :  { %7 = vsyncpa [#allocation3], 0  ;;  %s189_s0 = inlined_call_operand.hbm [shape: f32[4,512], index: 0, kind: input, shape index: {}]   ;;  %s190_s1 = inlined_call_operand.hbm [shape: f32[4,512], index: 1, kind: input, shape index: {}]   ;;  %s191_s2 = inlined_call_operand.hbm [shape: f32[4,512], index: 2, kind: output, shape index: {}]  }
   0x1   :  { %8 = vsyncpa [#allocation6], 0 }
   0x2   :  { %9 = vsyncpa [#allocation4], 0  ;;  %s135_s9 = smov [#allocation2]   ;;  %s136_s11 = smov [#allocation5]  }
   0x3   :  { %s16_s10 = sshll.u32 %s135_s9, 4  ;;  %s26_s12 = sshll.u32 %s136_s11, 4  ;;  %s17_s10 = int_to_ptr.vmem [resolvable:$true] %s16_s10  ;;  %s27_s12 = int_to_ptr.vmem [resolvable:$true] %s26_s12 }
   0x4   :  { %s63_s15 = scalar_lea.hbm %s189_s0, 256 }
   0x5   :  { %p64_p0 = scmp.ne.s32.totalorder %s189_s0, %s63_s15  ;;  %p67_p1 = scmp.lt.u32.totalorder %s63_s15, %s189_s0 }
   0x7   :  { %p69_p2 = pnand %p67_p1, %p64_p0 }
   0x9   :  { %72 = shalt.err (!%p69_p2)
}
   0xa   :  { %s73_s20 = scalar_lea.vmem %s17_s10, 256  ;;  %p78_p4 = scmp.lt.s32.totalorder %s17_s10, %s17_s10 }
   0xb   :  { %p74_p3 = scmp.ne.s32.totalorder %s17_s10, %s73_s20  ;;  %p79_p5 = scmp.lt.s32.totalorder %s73_s20, %s73_s20 }
   0xd   :  { %p80_p6 = por %p79_p5, %p78_p4 }
   0xf   :  { %p81_p7 = pnand %p80_p6, %p74_p3 }
  0x11   :  { %84 = shalt.err (!%p81_p7)
}
  0x12   :  { %19 = dma.hbm_to_vmem [thread:$0]  %s189_s0, 256, %s17_s10, [#allocation3]  }
  0x13   :  { %s85_s25 = scalar_lea.hbm %s190_s1, 256 }
  0x14   :  { %p86_p8 = scmp.ne.s32.totalorder %s190_s1, %s85_s25  ;;  %p89_p9 = scmp.lt.u32.totalorder %s85_s25, %s190_s1 }
  0x16   :  { %p91_p10 = pnand %p89_p9, %p86_p8 }
  0x18   :  { %94 = shalt.err (!%p91_p10)
}
  0x19   :  { %s95_s30 = scalar_lea.vmem %s27_s12, 256  ;;  %p100_p12 = scmp.lt.s32.totalorder %s27_s12, %s27_s12 }
  0x1a   :  { %p96_p11 = scmp.ne.s32.totalorder %s27_s12, %s95_s30  ;;  %p101_p13 = scmp.lt.s32.totalorder %s95_s30, %s95_s30 }
  0x1c   :  { %p102_p0 = por %p101_p13, %p100_p12 }
  0x1e   :  { %p103_p1 = pnand %p102_p0, %p96_p11 }
  0x20   :  { %106 = shalt.err (!%p103_p1)
}
  0x21   :  { %29 = dma.hbm_to_vmem [thread:$0]  %s190_s1, 256, %s27_s12, [#allocation6]  }
  0x22   :  { %129 = dma.done.wait [#allocation3], 256  }
  0x23   :  { %130 = vsyncadd [#allocation3], 4294967040 }
  0x24   :  { %131 = dma.done.wait [#allocation6], 256  }
  0x25   :  { %132 = vsyncadd [#allocation6], 4294967040  ;;  %s137_s4 = smov [#allocation7]   ;;  %v36_v0 = vld [vmem:[#allocation2] sm:$0xff]  ;;  %v38_v1 = vld [vmem:[#allocation5] sm:$0xff] }
  0x26   :  { %s50_s5 = sshll.u32 %s137_s4, 4  ;;  %v37_v2 = vld [vmem:[#allocation2 + $0x8] sm:$0xff]  ;;  %v40_v3 = vmul.f32 %v38_v1, %v36_v0  ;;  %v39_v4 = vld [vmem:[#allocation5 + $0x8] sm:$0xff]  ;;  %s51_s5 = int_to_ptr.vmem [resolvable:$true] %s50_s5 }
  0x27   :  { %v41_v5 = vmul.f32 %v39_v4, %v37_v2  ;;  %s107_s6 = scalar_lea.vmem %s51_s5, 256  ;;  %p112_p3 = scmp.lt.s32.totalorder %s51_s5, %s51_s5 }
  0x28   :  { %42 = vst [vmem:[#allocation7] sm:$0xff] %v40_v3  ;;  %p108_p2 = scmp.ne.s32.totalorder %s51_s5, %s107_s6  ;;  %p113_p4 = scmp.lt.s32.totalorder %s107_s6, %s107_s6 }
  0x29   :  { %43 = vst [vmem:[#allocation7 + $0x8] sm:$0xff] %v41_v5 }
  0x2a   :  { %p114_p5 = por %p113_p4, %p112_p3 }
  0x2c   :  { %p115_p6 = pnand %p114_p5, %p108_p2 }
  0x2e   :  { %118 = shalt.err (!%p115_p6)
}
  0x2f   :  { %s119_s8 = scalar_lea.hbm %s191_s2, 256 }
  0x30   :  { %p120_p7 = scmp.ne.s32.totalorder %s191_s2, %s119_s8  ;;  %p123_p8 = scmp.lt.u32.totalorder %s119_s8, %s191_s2 }
  0x32   :  { %p125_p9 = pnand %p123_p8, %p120_p7 }
  0x34   :  { %128 = shalt.err (!%p125_p9)
}
  0x35   :  { %53 = dma.vmem_to_hbm [thread:$0]  %s51_s5, 256, %s191_s2, [#allocation4]  }
  0x36   :  { %133 = dma.done.wait [#allocation4], 256  }
  0x37   :  { %134 = vsyncadd [#allocation4], 4294967040 }
  0x38   :  { %57 = vsyncpa [#allocation3], 1 }
  0x39   :  { %58 = vsyncpa [#allocation6], 1 }
  0x3a   :  { %59 = vsyncpa [#allocation4], 1 }

</bundles_post_ra>
